<compile_context>
chip_gen: v7x
topology: tpu7x:2x2x1
jax: 0.10.0
libtpu: 0.0.40
codegen_flags: <defaults>
</compile_context>

<pallas_src>
import functools

import jax
import jax.numpy as jnp
from jax.experimental import pallas as pl
from jax.experimental.pallas import tpu as pltpu

OBS_DIM = 13   # [x, y, z, qx, qy, qz, qw, vxb, vyb, vzb, rolldot, pitchdot, yawdot]
ACT_DIM = 2    # [throttle, steer]
HIDDENS = [32, 32]


def _round_up(x, m):
    return ((x + m - 1) // m) * m


def _mlp_kernel(x_ref, w1_ref, b1_ref, w2_ref, b2_ref, w3_ref, b3_ref, o_ref):
    """Feature-major MLP tile: x_ref is [in_dim, tb] with batch in the lane dim."""
    # Layer 1 (single dot; the obs/action concat already happened in the wrapper copy).
    h1 = jnp.tanh(
        jnp.dot(w1_ref[...], x_ref[...], preferred_element_type=jnp.float32)
        + b1_ref[...]                              # [h1, 1] broadcasts over lanes
    )
    # Layer 2
    h2 = jnp.tanh(
        jnp.dot(w2_ref[...], h1, preferred_element_type=jnp.float32) + b2_ref[...]
    )
    # Output layer (no activation); lane-dense store.
    o_ref[...] = (
        jnp.dot(w3_ref[...], h2, preferred_element_type=jnp.float32) + b3_ref[...]
    ).astype(o_ref.dtype)


def init_params(key, in_dim=OBS_DIM + ACT_DIM, out_dim=OBS_DIM, hiddens=HIDDENS):
    """Deterministic init mimicking torch.nn.Linear (uniform +/- 1/sqrt(fan_in))."""
    dims = [in_dim] + list(hiddens) + [out_dim]
    params = []
    for i in range(len(dims) - 1):
        fan_in, fan_out = dims[i], dims[i + 1]
        key, kw, kb = jax.random.split(key, 3)
        bound = 1.0 / jnp.sqrt(fan_in)
        w = jax.random.uniform(kw, (fan_in, fan_out), jnp.float32, -bound, bound)
        b = jax.random.uniform(kb, (1, fan_out), jnp.float32, -bound, bound)
        params.append((w, b))
    return params


def force_model_apply_t(x_t, params, *, batch_tile=2048):
    """Feature-major entry point: x_t is [in_dim, B]; returns [out_dim, B]."""
    (w1, b1), (w2, b2), (w3, b3) = params
    # Kernel-layout params (tiny; constant-folded / fused under jit).
    w1t = w1.T                      # [h1, in_dim]
    w2t = w2.T                      # [h2, h1]
    w3t = w3.T                      # [out_dim, h2]
    b1c = b1.reshape(-1, 1)         # [h1, 1]
    b2c = b2.reshape(-1, 1)         # [h2, 1]
    b3c = b3.reshape(-1, 1)         # [out_dim, 1]

    in_dim, B = x_t.shape
    h1_dim, h2_dim, out_dim = w1t.shape[0], w2t.shape[0], w3t.shape[0]

    # Batch tile (lane dim): multiple of 128, capped at batch_tile, and sized so
    # the grid has >= 2 steps whenever B allows it (v7x megacore sharding).
    batch_tile = max(128, (int(batch_tile) // 128) * 128)
    tb = min(batch_tile, _round_up(pl.cdiv(B, 2), 128))
    if tb >= B:
        tb = B                      # single block; lane dim == full array dim is legal
    grid = (pl.cdiv(B, tb),)        # ragged last block handled by Pallas masking

    def lane_spec(rows):
        # Full feature rows, batch tiled along lanes.
        return pl.BlockSpec((rows, tb), lambda i: (0, i))

    def const_spec(a):
        # Whole array, constant block index -> stays resident across grid steps.
        return pl.BlockSpec(a.shape, lambda i: (0, 0))

    n_weight_elems = (w1t.size + w2t.size + w3t.size + b1c.size + b2c.size + b3c.size)
    cost = pl.CostEstimate(
        flops=2 * B * (in_dim * h1_dim + h1_dim * h2_dim + h2_dim * out_dim),
        transcendentals=B * (h1_dim + h2_dim),
        bytes_accessed=4 * (B * (in_dim + out_dim) + n_weight_elems),
    )

    return pl.pallas_call(
        _mlp_kernel,
        out_shape=jax.ShapeDtypeStruct((out_dim, B), jnp.float32),
        grid=grid,
        in_specs=[
            lane_spec(in_dim),                       # x_t   [in_dim, tb]
            const_spec(w1t), const_spec(b1c),        # resident weights/biases
            const_spec(w2t), const_spec(b2c),
            const_spec(w3t), const_spec(b3c),
        ],
        out_specs=lane_spec(out_dim),                # y_t   [out_dim, tb] (lane-dense)
        compiler_params=pltpu.CompilerParams(
            dimension_semantics=("parallel",),       # v7x: batch tiles across 2 TCs
        ),
        cost_estimate=cost,
    )(x_t, w1t, b1c, w2t, b2c, w3t, b3c)


@functools.partial(jax.jit, static_argnames=("batch_tile",))
def force_model_forward(obs, action, params, *, batch_tile=2048):
    """ForceModel.forward: cat([obs, action], -1) -> MLP -> forces [B, obs_dim].

    The concat and the feature-major layout conversion are fused into one
    wrapper-side copy; the kernel itself works on [D, B]-major tiles.
    """
    obs = obs.astype(jnp.float32)
    action = action.astype(jnp.float32)
    x_t = jnp.concatenate([obs, action], axis=-1).T      # [in_dim, B]
    out_t = force_model_apply_t(x_t, params, batch_tile=batch_tile)
    return out_t.T                                        # [B, out_dim]


def _reference_forward(obs, action, params):
    x = jnp.concatenate([obs, action], axis=-1).astype(jnp.float32)
    (w1, b1), (w2, b2), (w3, b3) = params
    h1 = jnp.tanh(x @ w1 + b1)
    h2 = jnp.tanh(h1 @ w2 + b2)
    return h2 @ w3 + b3


# TODO(synk): predict()/get_model_predictions() depend on an external analytical
# kinematics model (self.kinematics.forward_dynamics) and an ObservationNormalizer
# (and contain pdb.set_trace() calls); only forward() is implemented here.

if __name__ == "__main__":
    key = jax.random.PRNGKey(0)
    kp, ko, ka, ko2, ka2 = jax.random.split(key, 5)

    params = init_params(kp)

    # Small smoke test: single block, lane dim == full (tiny) batch.
    B = 8
    obs = jax.random.normal(ko, (B, OBS_DIM), jnp.float32)
    action = jax.random.uniform(ka, (B, ACT_DIM), jnp.float32, -1.0, 1.0)

    out = jax.block_until_ready(force_model_forward(obs, action, params))
    ref = _reference_forward(obs, action, params)
    assert out.shape == (B, OBS_DIM), out.shape
    assert jnp.allclose(out, ref, atol=2e-5, rtol=2e-5), float(jnp.max(jnp.abs(out - ref)))

    # Larger, non-aligned batch: 2 pipelined grid steps with a ragged (masked)
    # last block — exercises the no-pad / masked-tail path.
    B2 = 1000
    obs2 = jax.random.normal(ko2, (B2, OBS_DIM), jnp.float32)
    action2 = jax.random.uniform(ka2, (B2, ACT_DIM), jnp.float32, -1.0, 1.0)

    out2 = jax.block_until_ready(force_model_forward(obs2, action2, params, batch_tile=512))
    ref2 = _reference_forward(obs2, action2, params)
    assert out2.shape == (B2, OBS_DIM), out2.shape
    assert jnp.allclose(out2, ref2, atol=2e-5, rtol=2e-5), float(jnp.max(jnp.abs(out2 - ref2)))

    print("KERNEL_OK")
</pallas_src>

<mosaic_0001>
module attributes {stable_mosaic.version = 11 : i64} {
  func.func @_mlp_kernel(%arg0: i32, %arg1: memref<15x8xf32, #tpu.memory_space<vmem>>, %arg2: memref<32x15xf32, #tpu.memory_space<vmem>>, %arg3: memref<32x1xf32, #tpu.memory_space<vmem>>, %arg4: memref<32x32xf32, #tpu.memory_space<vmem>>, %arg5: memref<32x1xf32, #tpu.memory_space<vmem>>, %arg6: memref<13x32xf32, #tpu.memory_space<vmem>>, %arg7: memref<13x1xf32, #tpu.memory_space<vmem>>, %arg8: memref<13x8xf32, #tpu.memory_space<vmem>>) attributes {dimension_semantics = [#tpu.dimension_semantics<parallel>], iteration_bounds = array<i64: 1>, scalar_prefetch = 0 : i64, scratch_operands = 0 : i64, tpu.core_type = #tpu.core_type<tc>, window_params = [{transform_indices = @transform_0, window_bounds = array<i64: 15, 8>}, {pipeline_mode = #tpu.pipeline_mode<synchronous>, transform_indices = @transform_1, window_bounds = array<i64: 32, 15>}, {pipeline_mode = #tpu.pipeline_mode<synchronous>, transform_indices = @transform_2, window_bounds = array<i64: 32, 1>}, {pipeline_mode = #tpu.pipeline_mode<synchronous>, transform_indices = @transform_3, window_bounds = array<i64: 32, 32>}, {pipeline_mode = #tpu.pipeline_mode<synchronous>, transform_indices = @transform_4, window_bounds = array<i64: 32, 1>}, {pipeline_mode = #tpu.pipeline_mode<synchronous>, transform_indices = @transform_5, window_bounds = array<i64: 13, 32>}, {pipeline_mode = #tpu.pipeline_mode<synchronous>, transform_indices = @transform_6, window_bounds = array<i64: 13, 1>}, {transform_indices = @transform_7, window_bounds = array<i64: 13, 8>}]} {
    %c0 = arith.constant 0 : index
    %c0_0 = arith.constant 0 : index
    %0 = vector.load %arg2[%c0, %c0_0] : memref<32x15xf32, #tpu.memory_space<vmem>>, vector<32x15xf32>
    %c0_1 = arith.constant 0 : index
    %c0_2 = arith.constant 0 : index
    %1 = vector.load %arg1[%c0_1, %c0_2] : memref<15x8xf32, #tpu.memory_space<vmem>>, vector<15x8xf32>
    %cst = arith.constant dense<0.000000e+00> : vector<32x8xf32>
    %2 = tpu.matmul %0, %1, %cst {dimension_numbers = #tpu.dot_dimension_numbers<[1], [0], [0], [1], [0, 0, 1, 1], [], []>} : vector<32x15xf32>, vector<15x8xf32>, vector<32x8xf32> -> vector<32x8xf32>
    %c0_3 = arith.constant 0 : index
    %c0_4 = arith.constant 0 : index
    %3 = vector.load %arg3[%c0_3, %c0_4] : memref<32x1xf32, #tpu.memory_space<vmem>>, vector<32x1xf32>
    %4 = vector.broadcast %3 : vector<32x1xf32> to vector<32x8xf32>
    %5 = arith.addf %2, %4 : vector<32x8xf32>
    %6 = math.tanh %5 : vector<32x8xf32>
    %c0_5 = arith.constant 0 : index
    %c0_6 = arith.constant 0 : index
    %7 = vector.load %arg4[%c0_5, %c0_6] : memref<32x32xf32, #tpu.memory_space<vmem>>, vector<32x32xf32>
    %cst_7 = arith.constant dense<0.000000e+00> : vector<32x8xf32>
    %8 = tpu.matmul %7, %6, %cst_7 {dimension_numbers = #tpu.dot_dimension_numbers<[1], [0], [0], [1], [0, 0, 1, 1], [], []>} : vector<32x32xf32>, vector<32x8xf32>, vector<32x8xf32> -> vector<32x8xf32>
    %c0_8 = arith.constant 0 : index
    %c0_9 = arith.constant 0 : index
    %9 = vector.load %arg5[%c0_8, %c0_9] : memref<32x1xf32, #tpu.memory_space<vmem>>, vector<32x1xf32>
    %10 = vector.broadcast %9 : vector<32x1xf32> to vector<32x8xf32>
    %11 = arith.addf %8, %10 : vector<32x8xf32>
    %12 = math.tanh %11 : vector<32x8xf32>
    %c0_10 = arith.constant 0 : index
    %c0_11 = arith.constant 0 : index
    %13 = vector.load %arg6[%c0_10, %c0_11] : memref<13x32xf32, #tpu.memory_space<vmem>>, vector<13x32xf32>
    %cst_12 = arith.constant dense<0.000000e+00> : vector<13x8xf32>
    %14 = tpu.matmul %13, %12, %cst_12 {dimension_numbers = #tpu.dot_dimension_numbers<[1], [0], [0], [1], [0, 0, 1, 1], [], []>} : vector<13x32xf32>, vector<32x8xf32>, vector<13x8xf32> -> vector<13x8xf32>
    %c0_13 = arith.constant 0 : index
    %c0_14 = arith.constant 0 : index
    %15 = vector.load %arg7[%c0_13, %c0_14] : memref<13x1xf32, #tpu.memory_space<vmem>>, vector<13x1xf32>
    %16 = vector.broadcast %15 : vector<13x1xf32> to vector<13x8xf32>
    %17 = arith.addf %14, %16 : vector<13x8xf32>
    %c0_15 = arith.constant 0 : index
    %c0_16 = arith.constant 0 : index
    %18 = vector.load %arg8[%c0_15, %c0_16] : memref<13x8xf32, #tpu.memory_space<vmem>>, vector<13x8xf32>
    tpu.vector_store %arg8[%c0_15, %c0_16], %17 {strides = array<i32>} : memref<13x8xf32, #tpu.memory_space<vmem>>, vector<13x8xf32>,
    return
  }
  func.func @transform_0(%arg0: i32) -> (i32, i32) {
    %c0_i32 = arith.constant 0 : i32
    %c0_i32_0 = arith.constant 0 : i32
    return %c0_i32, %arg0 : i32, i32
  }
  func.func @transform_1(%arg0: i32) -> (i32, i32) {
    %c0_i32 = arith.constant 0 : i32
    %c0_i32_0 = arith.constant 0 : i32
    %c0_i32_1 = arith.constant 0 : i32
    return %c0_i32, %c0_i32_0 : i32, i32
  }
  func.func @transform_2(%arg0: i32) -> (i32, i32) {
    %c0_i32 = arith.constant 0 : i32
    %c0_i32_0 = arith.constant 0 : i32
    %c0_i32_1 = arith.constant 0 : i32
    return %c0_i32, %c0_i32_0 : i32, i32
  }
  func.func @transform_3(%arg0: i32) -> (i32, i32) {
    %c0_i32 = arith.constant 0 : i32
    %c0_i32_0 = arith.constant 0 : i32
    %c0_i32_1 = arith.constant 0 : i32
    return %c0_i32, %c0_i32_0 : i32, i32
  }
  func.func @transform_4(%arg0: i32) -> (i32, i32) {
    %c0_i32 = arith.constant 0 : i32
    %c0_i32_0 = arith.constant 0 : i32
    %c0_i32_1 = arith.constant 0 : i32
    return %c0_i32, %c0_i32_0 : i32, i32
  }
  func.func @transform_5(%arg0: i32) -> (i32, i32) {
    %c0_i32 = arith.constant 0 : i32
    %c0_i32_0 = arith.constant 0 : i32
    %c0_i32_1 = arith.constant 0 : i32
    return %c0_i32, %c0_i32_0 : i32, i32
  }
  func.func @transform_6(%arg0: i32) -> (i32, i32) {
    %c0_i32 = arith.constant 0 : i32
    %c0_i32_0 = arith.constant 0 : i32
    %c0_i32_1 = arith.constant 0 : i32
    return %c0_i32, %c0_i32_0 : i32, i32
  }
  func.func @transform_7(%arg0: i32) -> (i32, i32) {
    %c0_i32 = arith.constant 0 : i32
    %c0_i32_0 = arith.constant 0 : i32
    return %c0_i32, %arg0 : i32, i32
  }
}

</mosaic_0001>

<bundles_post_ra>
// kernel: force_model_forward.1
= control target key start
LH: loop header
LB: loop body
LE: loop exit
PB: predicated region body
PF: predicated region fallthrough
CT: control target
= control target key end

     0   :  { %vm69_vm0 = vcmask 1046528   ;;  %vm56_vm1 = vcmask 121856   ;;  %vm503_vm2 = vmmov 1   ;;  %v504_v2 = vmov 0   ;;  %s627_s0 = inlined_call_operand.vmem [shape: f32[15,8], index: 0, kind: input, shape index: {}]   ;;  %s628_s1 = inlined_call_operand.vmem [shape: f32[32,15], index: 1, kind: input, shape index: {}]   ;;  %s629_s2 = inlined_call_operand.vmem [shape: f32[32,1], index: 2, kind: input, shape index: {}]   ;;  %s630_s4 = inlined_call_operand.vmem [shape: f32[32,1], index: 4, kind: input, shape index: {}]   ;;  %s631_s6 = inlined_call_operand.vmem [shape: f32[13,1], index: 6, kind: input, shape index: {}]   ;;  %s632_s3 = inlined_call_operand.vmem [shape: f32[32,32], index: 3, kind: input, shape index: {}]   ;;  %s633_s5 = inlined_call_operand.vmem [shape: f32[13,32], index: 5, kind: input, shape index: {}]   ;;  %s634_s7 = inlined_call_operand.vmem [shape: f32[13,8], index: 7, kind: output, shape index: {}]  }
   0x1   :  { %v30_v0 = vld [vmem:[%s627_s0] sm:$0xff]  ;;  %v31_v1 = vld [vmem:[%s627_s0 + $0x8] sm:$0x7f]  ;;  %vm462_vm3 = vmpackc.low %vm69_vm0, %vm503_vm2  ;;  %485 = vset.pattern.permute.xlu0 %v504_v2  ;;  %486 = vset.pattern.permute.xlu1 %v504_v2  ;;  %vm190_vm4 = vcmask 261120   ;;  %vm389_vm5 = vcmask 61440   ;;  %vm387_vm6 = vcmask 64512  }
   0x2   :  { %v461_v3 = vpack.c.bf16 %v31_v1, %v30_v0  ;;  %v26_v4 = vld [vmem:[%s628_s1] sm:$0xff]  ;;  %v34_v6 = vld [vmem:[%s629_s2 + $0x10] sm:$0xff]  ;;  %v27_v7 = vld [vmem:[%s628_s1 + $0x8] sm:$0xff] }
   0x3   :  { %430 = vmatprep.mubr.msk.f32.mxu0 %vm56_vm1, %v26_v4  ;;  %v32_v5 = vld [vmem:[%s629_s2] sm:$0xff]  ;;  %48 = vperm.xlu1 %486, %v34_v6   ;;  %v33_v8 = vld [vmem:[%s629_s2 + $0x8] sm:$0xff]  ;;  %v28_v9 = vld [vmem:[%s628_s1 + $0x10] sm:$0xff] }
   0x4   :  { %463 = vmatprep.subr.msk.bf16.mxu0 %vm462_vm3, %v461_v3  ;;  %38 = vperm.xlu0 %485, %v32_v5   ;;  %v35_v10 = vld [vmem:[%s629_s2 + $0x18] sm:$0xff]  ;;  %v166_v12 = vld [vmem:[%s630_s4] sm:$0xff]  ;;  %v167_v13 = vld [vmem:[%s630_s4 + $0x8] sm:$0xff] }
   0x5   :  { %466 = vmatpush3.bf16.msk.msra.mxu0 %vm462_vm3, %v461_v3  ;;  %v29_v11 = vld [vmem:[%s628_s1 + $0x18] sm:$0xff]  ;;  %v168_v14 = vld [vmem:[%s630_s4 + $0x10] sm:$0xff]  ;;  %v294_v16 = vld [vmem:[%s631_s6] sm:$0xff] }
   0x6   :  { %v169_v15 = vld [vmem:[%s630_s4 + $0x18] sm:$0xff]  ;;  %v295_v17 = vld [vmem:[%s631_s6 + $0x8] sm:$0x1f]  ;;  %v162_v18 = vld [vmem:[%s632_s3] sm:$0xff] }
   0x7   :  { %53 = vperm.xlu1 %486, %v35_v10   ;;  %444 = vmatprep.mubr.msk.f32.mxu1 %vm190_vm4, %v162_v18  ;;  %v163_v37 = vld [vmem:[%s632_s3 + $0x8] sm:$0xff]  ;;  %v164_v38 = vld [vmem:[%s632_s3 + $0x10] sm:$0xff]  ;;  %v165_v39 = vld [vmem:[%s632_s3 + $0x18] sm:$0xff] }
   0x8   :  { %431 = vmatmul.mubr.msk.f32.vlgmr.msra.gmra.mrb[0].mxu0 %vm56_vm1, %v27_v7  ;;  %43 = vperm.xlu0 %485, %v33_v8   ;;  %v292_v40 = vld [vmem:[%s633_s5] sm:$0xff]  ;;  %v293_v59 = vld [vmem:[%s633_s5 + $0x8] sm:$0x1f] }
   0x9   :  { %433 = vmatprep.mubr.msk.f32.mxu0 %vm56_vm1, %v28_v9 }
   0xb   :  { %177 = vperm.xlu1 %486, %v167_v13  }
   0xc   :  { %434 = vmatmul.mubr.msk.f32.gmra.mrb[2].mxu0 %vm56_vm1, %v29_v11  ;;  %172 = vperm.xlu0 %485, %v166_v12  }
   0xd   :  { %458 = vmatprep.mubr.msk.f32.mxu0 %vm190_vm4, %v292_v40 }
   0xf   :  { %187 = vperm.xlu1 %486, %v169_v15  }
  0x10   :  { %182 = vperm.xlu0 %485, %v168_v14  }
  0x13   :  { %303 = vperm.xlu1 %486, %v295_v17  }
  0x14   :  { %298 = vperm.xlu0 %485, %v294_v16  }
  0x82   :  { %v49_v20 = vpop.permute.xlu1 %48 }
  0x83   :  { %v39_v19 = vpop.permute.xlu0 %38 }
  0x86   :  { %v54_v26 = vpop.permute.xlu1 %53 }
  0x87   :  { %v44_v21 = vpop.permute.xlu0 %43 }
  0x8a   :  { %v178_v41 = vpop.permute.xlu1 %177 }
  0x8b   :  { %v173_v42 = vpop.permute.xlu0 %172 }
  0x8e   :  { %v188_v47 = vpop.permute.xlu1 %187 }
  0x8f   :  { %v183_v49 = vpop.permute.xlu0 %182 }
  0x92   :  { %v304_v60 = vpop.permute.xlu1 %303 }
  0x93   :  { %v299_v62 = vpop.permute.xlu0 %298 }
  0xdb   :  { %v432_v22 = vpop.f32.mrb[0].mxu0 }
  0xdc   :  { %v145_v23 = vadd.f32 %v432_v22, %v44_v21  ;;  %v139_v24 = vpop.f32.mrb[1].mxu0 }
  0xdd   :  { %v140_v25 = vadd.f32 %v139_v24, %v39_v19 }
  0xde   :  { %487 = vtanh.f32 %v145_v23 }
  0xdf   :  { %489 = vtanh.f32 %v140_v25  ;;  %v435_v27 = vpop.f32.mrb[2].mxu0 }
  0xe0   :  { %v155_v28 = vadd.f32 %v435_v27, %v54_v26  ;;  %v149_v29 = vpop.f32.mrb[3].mxu0 }
  0xe1   :  { %v150_v30 = vadd.f32 %v149_v29, %v49_v20 }
  0xe2   :  { %491 = vtanh.f32 %v155_v28 }
  0xe3   :  { %493 = vtanh.f32 %v150_v30 }
  0xe8   :  { %v488_v31 = vpop.eup %487 }
  0xe9   :  { %v490_v32 = vpop.eup %489 }
  0xea   :  { %v467_v33 = vpack.c.bf16 %v488_v31, %v490_v32 }
  0xec   :  { %v492_v34 = vpop.eup %491  ;;  %468 = vmatprep.subr.bf16.mxu1 %v467_v33 }
  0xed   :  { %v494_v35 = vpop.eup %493  ;;  %470 = vmatpush3.bf16.msra.mxu1 %v467_v33 }
  0xee   :  { %v471_v36 = vpack.c.bf16 %v492_v34, %v494_v35 }
  0xf0   :  { %472 = vmatprep.subr.bf16.mxu1 %v471_v36 }
  0xf1   :  { %474 = vmatpush3.bf16.msra.mxu1 %v471_v36 }
  0xf4   :  { %445 = vmatmul.mubr.msk.f32.vlgmr.msra.gmra.mrb[0].mxu1 %vm190_vm4, %v163_v37 }
  0xf5   :  { %447 = vmatprep.mubr.msk.f32.mxu1 %vm190_vm4, %v164_v38 }
  0xf8   :  { %448 = vmatmul.mubr.msk.f32.gmra.mrb[2].mxu1 %vm190_vm4, %v165_v39 }
 0x1c7   :  { %v446_v43 = vpop.f32.mrb[0].mxu1 }
 0x1c8   :  { %v275_v44 = vadd.f32 %v446_v43, %v178_v41  ;;  %v269_v45 = vpop.f32.mrb[1].mxu1 }
 0x1c9   :  { %v270_v46 = vadd.f32 %v269_v45, %v173_v42 }
 0x1ca   :  { %495 = vtanh.f32 %v275_v44 }
 0x1cb   :  { %497 = vtanh.f32 %v270_v46  ;;  %v449_v48 = vpop.f32.mrb[2].mxu1 }
 0x1cc   :  { %v285_v50 = vadd.f32 %v449_v48, %v188_v47  ;;  %v279_v51 = vpop.f32.mrb[3].mxu1 }
 0x1cd   :  { %v280_v52 = vadd.f32 %v279_v51, %v183_v49 }
 0x1ce   :  { %499 = vtanh.f32 %v285_v50 }
 0x1cf   :  { %501 = vtanh.f32 %v280_v52 }
 0x1d4   :  { %v496_v53 = vpop.eup %495 }
 0x1d5   :  { %v498_v54 = vpop.eup %497 }
 0x1d6   :  { %v475_v55 = vpack.c.bf16 %v496_v53, %v498_v54 }
 0x1d8   :  { %v500_v56 = vpop.eup %499  ;;  %476 = vmatprep.subr.bf16.mxu0 %v475_v55 }
 0x1d9   :  { %v502_v57 = vpop.eup %501  ;;  %478 = vmatpush3.bf16.msra.mxu0 %v475_v55 }
 0x1da   :  { %v479_v58 = vpack.c.bf16 %v500_v56, %v502_v57 }
 0x1dc   :  { %480 = vmatprep.subr.bf16.mxu0 %v479_v58 }
 0x1dd   :  { %482 = vmatpush3.bf16.msra.mxu0 %v479_v58 }
 0x1e0   :  { %459 = vmatmul.mubr.msk.f32.vlgmr.msra.gmra.mrb[4].mxu0 %vm190_vm4, %v293_v59 }
 0x2b3   :  { %v460_v61 = vpop.f32.mrb[4].mxu0 }
 0x2b4   :  { %v384_v63 = vadd.f32 %v460_v61, %v304_v60  ;;  %v378_v0 = vpop.f32.mrb[5].mxu0 }
 0x2b5   :  { %v379_v1 = vadd.f32 %v378_v0, %v299_v62 }
 0x2b6   :  { %390 = vst.msk [vmem:[%s634_s7 + $0x8] sm:$0x1f] %vm389_vm5, %v384_v63 }
 0x2b7   :  { %388 = vst.msk [vmem:[%s634_s7] sm:$0xff] %vm387_vm6, %v379_v1 }

</bundles_post_ra>
